<compile_context>
chip_gen: v7x
topology: tpu7x:2x2x1
jax: 0.10.0
libtpu: 0.0.40
codegen_flags: <defaults>
</compile_context>

<pallas_src>
import functools

import jax
import jax.numpy as jnp
from jax.experimental import pallas as pl
from jax.experimental.pallas import tpu as pltpu

HIDDEN = 32  # nn.Linear(embedding_size, 32)


def _self_attend_kernel(*refs, tb, s, e, has_mask):
    if has_mask:
        seqs_ref, mask_ref, w1_ref, b1_ref, w2_ref, out_ref = refs
    else:
        seqs_ref, w1_ref, b1_ref, w2_ref, out_ref = refs

    x = seqs_ref[...].astype(jnp.float32)                 # (TB, S, E)

    # Linear(E -> 32) + tanh as ONE MXU matmul over all TB*S rows.
    # (reshape merges leading dims only -> layout-free)
    x2 = x.reshape(tb * s, e)
    h = jnp.tanh(
        jnp.dot(x2, w1_ref[...], preferred_element_type=jnp.float32)
        + b1_ref[...])                                     # (TB*S, 32)

    # gate Linear(32 -> 1): N=1 matmul replaced by VPU multiply + lane reduce.
    h3 = h.reshape(tb, s, HIDDEN)                          # (TB, S, 32)
    g = jnp.sum(h3 * w2_ref[...], axis=-1)                 # (TB, S), lane-major
    # b2 intentionally omitted: adding a scalar before softmax cannot change
    # the output (shift invariance).

    if has_mask:
        g = g + mask_ref[...].astype(jnp.float32)          # (TB, S)

    # softmax over the sequence axis (lane axis)
    m = jnp.max(g, axis=-1, keepdims=True)                 # (TB, 1)
    ex = jnp.exp(g - m)                                    # (TB, S)
    denom = jnp.sum(ex, axis=-1, keepdims=True)            # (TB, 1)
    p = ex * pl.reciprocal(denom, approx=False)            # (TB, S)

    # weighted sum over the sequence axis
    out = jnp.sum(x * p[:, :, None], axis=1)               # (TB, E)
    out_ref[...] = out.astype(out_ref.dtype)


def _pick_tb(batch, seq_len, emb):
    """Pick a batch-tile size TB and the padded batch it implies."""
    bytes_per_seq = 2 * seq_len * emb * 4      # double-buffered f32 tile
    budget = 8 << 20                           # conservative for v5e/v7x defaults
    max_tb = max(1, budget // bytes_per_seq)
    if batch <= max_tb:
        # Whole batch fits; still split into 2 grid steps when cheap so both
        # v7x TensorCores get a shard of the "parallel" batch axis.
        if batch >= 16 and batch % 16 == 0:
            return batch // 2, batch
        return batch, batch
    tb = max(8, (max_tb // 8) * 8)             # multiple of 8 (sublane tiling)
    padded = -(-batch // tb) * tb
    return tb, padded


def self_attend(seqs, w1, b1, w2, b2=None, seq_masks=None):
    """seqs: [B, S, E]; w1: [E, 32]; b1: [32]; w2: [32, 1]; b2 unused (see note);
    seq_masks: optional additive mask [B, S]."""
    B, S, E = seqs.shape
    has_mask = seq_masks is not None
    tb, padded_b = _pick_tb(B, S, E)

    if padded_b != B:
        pad = padded_b - B
        seqs_in = jnp.pad(seqs, ((0, pad), (0, 0), (0, 0)))
        mask_in = jnp.pad(seq_masks, ((0, pad), (0, 0))) if has_mask else None
    else:
        seqs_in = seqs
        mask_in = seq_masks

    w1_in = w1.astype(jnp.float32)                           # (E, 32)
    b1_in = b1.reshape(1, HIDDEN).astype(jnp.float32)        # (1, 32)
    w2_in = w2.reshape(1, HIDDEN).astype(jnp.float32)        # (1, 32) row
    # b2 is mathematically redundant under softmax -> not DMA'd at all.

    in_specs = [pl.BlockSpec((tb, S, E), lambda i: (i, 0, 0))]   # seqs
    operands = [seqs_in]
    if has_mask:
        in_specs.append(pl.BlockSpec((tb, S), lambda i: (i, 0)))  # mask, lane-dense
        operands.append(mask_in)
    in_specs += [
        pl.BlockSpec((E, HIDDEN), lambda i: (0, 0)),             # W1
        pl.BlockSpec((1, HIDDEN), lambda i: (0, 0)),             # b1
        pl.BlockSpec((1, HIDDEN), lambda i: (0, 0)),             # W2 row
    ]
    operands += [w1_in, b1_in, w2_in]

    kernel = functools.partial(
        _self_attend_kernel, tb=tb, s=S, e=E, has_mask=has_mask)

    itemsize = seqs.dtype.itemsize
    flops = (2 * padded_b * S * E * HIDDEN       # first matmul
             + 3 * padded_b * S * HIDDEN         # gate mult + reduce
             + 3 * padded_b * S * E)             # weighted sum + reduce
    transcendentals = padded_b * S * (HIDDEN + 1)   # tanh + exp
    bytes_accessed = (seqs_in.size * itemsize
                      + (mask_in.size * mask_in.dtype.itemsize if has_mask else 0)
                      + padded_b * E * itemsize
                      + (E + 2) * HIDDEN * 4)

    out = pl.pallas_call(
        kernel,
        out_shape=jax.ShapeDtypeStruct((padded_b, E), seqs.dtype),
        grid_spec=pltpu.PrefetchScalarGridSpec(
            num_scalar_prefetch=0,
            grid=(padded_b // tb,),
            in_specs=in_specs,
            out_specs=pl.BlockSpec((tb, E), lambda i: (i, 0)),   # lane-dense
        ),
        compiler_params=pltpu.CompilerParams(
            dimension_semantics=("parallel",)),
        cost_estimate=pl.CostEstimate(
            flops=flops,
            transcendentals=transcendentals,
            bytes_accessed=bytes_accessed),
    )(*operands)

    return out[:B] if padded_b != B else out


def _reference(seqs, w1, b1, w2, b2, seq_masks=None):
    h = jnp.tanh(seqs @ w1 + b1)
    gates = (h @ w2 + b2)[..., 0]
    if seq_masks is not None:
        gates = gates + seq_masks
    p = jax.nn.softmax(gates, axis=-1)[..., None]
    return jnp.sum(seqs * p, axis=1)


if __name__ == "__main__":
    B, S, E = 2, 8, 32

    key = jax.random.PRNGKey(0)
    k_x, k_m, k_w1, k_b1, k_w2, k_b2 = jax.random.split(key, 6)

    seqs = jax.random.normal(k_x, (B, S, E), dtype=jnp.float32)
    seq_masks = jnp.where(
        jax.random.uniform(k_m, (B, S)) > 0.25, 0.0, -1e9).astype(jnp.float32)

    # Deterministic parameter init (PyTorch Linear-style uniform bounds).
    bound1 = 1.0 / (E ** 0.5)
    w1 = jax.random.uniform(k_w1, (E, HIDDEN), jnp.float32, -bound1, bound1)
    b1 = jax.random.uniform(k_b1, (HIDDEN,), jnp.float32, -bound1, bound1)
    bound2 = 1.0 / (HIDDEN ** 0.5)
    w2 = jax.random.uniform(k_w2, (HIDDEN, 1), jnp.float32, -bound2, bound2)
    b2 = jax.random.uniform(k_b2, (1,), jnp.float32, -bound2, bound2)

    # With mask
    out = jax.block_until_ready(self_attend(seqs, w1, b1, w2, b2, seq_masks))
    ref = _reference(seqs, w1, b1, w2, b2, seq_masks)
    assert out.shape == (B, E)
    assert jnp.allclose(out, ref, atol=1e-5, rtol=1e-5)

    # Without mask (exercises the mask-free specialization: no zeros DMA)
    out_nm = jax.block_until_ready(self_attend(seqs, w1, b1, w2, b2, None))
    ref_nm = _reference(seqs, w1, b1, w2, b2, None)
    assert jnp.allclose(out_nm, ref_nm, atol=1e-5, rtol=1e-5)

    print("KERNEL_OK")
</pallas_src>

<mosaic_0001>
module attributes {stable_mosaic.version = 11 : i64} {
  func.func @_self_attend_kernel(%arg0: i32, %arg1: memref<2x8x32xf32, #tpu.memory_space<vmem>>, %arg2: memref<2x8xf32, #tpu.memory_space<vmem>>, %arg3: memref<32x32xf32, #tpu.memory_space<vmem>>, %arg4: memref<1x32xf32, #tpu.memory_space<vmem>>, %arg5: memref<1x32xf32, #tpu.memory_space<vmem>>, %arg6: memref<2x32xf32, #tpu.memory_space<vmem>>) attributes {dimension_semantics = [#tpu.dimension_semantics<parallel>], iteration_bounds = array<i64: 1>, scalar_prefetch = 0 : i64, scratch_operands = 0 : i64, tpu.core_type = #tpu.core_type<tc>, window_params = [{transform_indices = @transform_0, window_bounds = array<i64: 2, 8, 32>}, {transform_indices = @transform_1, window_bounds = array<i64: 2, 8>}, {pipeline_mode = #tpu.pipeline_mode<synchronous>, transform_indices = @transform_2, window_bounds = array<i64: 32, 32>}, {pipeline_mode = #tpu.pipeline_mode<synchronous>, transform_indices = @transform_3, window_bounds = array<i64: 1, 32>}, {pipeline_mode = #tpu.pipeline_mode<synchronous>, transform_indices = @transform_4, window_bounds = array<i64: 1, 32>}, {transform_indices = @transform_5, window_bounds = array<i64: 2, 32>}]} {
    %c0 = arith.constant 0 : index
    %c0_0 = arith.constant 0 : index
    %c0_1 = arith.constant 0 : index
    %0 = vector.load %arg1[%c0, %c0_0, %c0_1] : memref<2x8x32xf32, #tpu.memory_space<vmem>>, vector<2x8x32xf32>
    %1 = vector.shape_cast %0 : vector<2x8x32xf32> to vector<16x32xf32>
    %c0_2 = arith.constant 0 : index
    %c0_3 = arith.constant 0 : index
    %2 = vector.load %arg3[%c0_2, %c0_3] : memref<32x32xf32, #tpu.memory_space<vmem>>, vector<32x32xf32>
    %cst = arith.constant dense<0.000000e+00> : vector<16x32xf32>
    %3 = tpu.matmul %1, %2, %cst {dimension_numbers = #tpu.dot_dimension_numbers<[1], [0], [0], [1], [0, 0, 1, 1], [], []>} : vector<16x32xf32>, vector<32x32xf32>, vector<16x32xf32> -> vector<16x32xf32>
    %c0_4 = arith.constant 0 : index
    %c0_5 = arith.constant 0 : index
    %4 = vector.load %arg4[%c0_4, %c0_5] : memref<1x32xf32, #tpu.memory_space<vmem>>, vector<1x32xf32>
    %5 = vector.broadcast %4 : vector<1x32xf32> to vector<16x32xf32>
    %6 = arith.addf %3, %5 : vector<16x32xf32>
    %7 = math.tanh %6 : vector<16x32xf32>
    %8 = vector.shape_cast %7 : vector<16x32xf32> to vector<2x8x32xf32>
    %c0_6 = arith.constant 0 : index
    %c0_7 = arith.constant 0 : index
    %9 = vector.load %arg5[%c0_6, %c0_7] : memref<1x32xf32, #tpu.memory_space<vmem>>, vector<1x32xf32>
    %10 = vector.shape_cast %9 : vector<1x32xf32> to vector<1x1x32xf32>
    %11 = vector.broadcast %10 : vector<1x1x32xf32> to vector<2x8x32xf32>
    %12 = arith.mulf %8, %11 : vector<2x8x32xf32>
    %cst_8 = arith.constant dense<0.000000e+00> : vector<2x8xf32>
    %13 = vector.multi_reduction <add>, %12, %cst_8 [2] : vector<2x8x32xf32> to vector<2x8xf32>
    %c0_9 = arith.constant 0 : index
    %c0_10 = arith.constant 0 : index
    %14 = vector.load %arg2[%c0_9, %c0_10] : memref<2x8xf32, #tpu.memory_space<vmem>>, vector<2x8xf32>
    %15 = arith.addf %13, %14 : vector<2x8xf32>
    %cst_11 = arith.constant dense<0xFF800000> : vector<2xf32>
    %16 = vector.multi_reduction <maximumf>, %15, %cst_11 [1] : vector<2x8xf32> to vector<2xf32>
    %17 = vector.shape_cast %16 : vector<2xf32> to vector<2x1xf32>
    %18 = vector.broadcast %17 : vector<2x1xf32> to vector<2x8xf32>
    %19 = arith.subf %15, %18 : vector<2x8xf32>
    %20 = math.exp %19 : vector<2x8xf32>
    %cst_12 = arith.constant dense<0.000000e+00> : vector<2xf32>
    %21 = vector.multi_reduction <add>, %20, %cst_12 [1] : vector<2x8xf32> to vector<2xf32>
    %22 = vector.shape_cast %21 : vector<2xf32> to vector<2x1xf32>
    %23 = tpu.reciprocal %22 : vector<2x1xf32> -> vector<2x1xf32>
    %24 = vector.broadcast %23 : vector<2x1xf32> to vector<2x8xf32>
    %25 = arith.mulf %20, %24 : vector<2x8xf32>
    %26 = vector.shape_cast %25 : vector<2x8xf32> to vector<2x8x1xf32>
    %27 = vector.broadcast %26 : vector<2x8x1xf32> to vector<2x8x32xf32>
    %28 = arith.mulf %0, %27 : vector<2x8x32xf32>
    %cst_13 = arith.constant dense<0.000000e+00> : vector<2x32xf32>
    %29 = vector.multi_reduction <add>, %28, %cst_13 [1] : vector<2x8x32xf32> to vector<2x32xf32>
    %c0_14 = arith.constant 0 : index
    %c0_15 = arith.constant 0 : index
    %30 = vector.load %arg6[%c0_14, %c0_15] : memref<2x32xf32, #tpu.memory_space<vmem>>, vector<2x32xf32>
    tpu.vector_store %arg6[%c0_14, %c0_15], %29 {strides = array<i32>} : memref<2x32xf32, #tpu.memory_space<vmem>>, vector<2x32xf32>,
    return
  }
  func.func @transform_0(%arg0: i32) -> (i32, i32, i32) {
    %c0_i32 = arith.constant 0 : i32
    %c0_i32_0 = arith.constant 0 : i32
    %c0_i32_1 = arith.constant 0 : i32
    return %arg0, %c0_i32, %c0_i32_0 : i32, i32, i32
  }
  func.func @transform_1(%arg0: i32) -> (i32, i32) {
    %c0_i32 = arith.constant 0 : i32
    %c0_i32_0 = arith.constant 0 : i32
    return %arg0, %c0_i32 : i32, i32
  }
  func.func @transform_2(%arg0: i32) -> (i32, i32) {
    %c0_i32 = arith.constant 0 : i32
    %c0_i32_0 = arith.constant 0 : i32
    %c0_i32_1 = arith.constant 0 : i32
    return %c0_i32, %c0_i32_0 : i32, i32
  }
  func.func @transform_3(%arg0: i32) -> (i32, i32) {
    %c0_i32 = arith.constant 0 : i32
    %c0_i32_0 = arith.constant 0 : i32
    %c0_i32_1 = arith.constant 0 : i32
    return %c0_i32, %c0_i32_0 : i32, i32
  }
  func.func @transform_4(%arg0: i32) -> (i32, i32) {
    %c0_i32 = arith.constant 0 : i32
    %c0_i32_0 = arith.constant 0 : i32
    %c0_i32_1 = arith.constant 0 : i32
    return %c0_i32, %c0_i32_0 : i32, i32
  }
  func.func @transform_5(%arg0: i32) -> (i32, i32) {
    %c0_i32 = arith.constant 0 : i32
    %c0_i32_0 = arith.constant 0 : i32
    return %arg0, %c0_i32 : i32, i32
  }
}

</mosaic_0001>

<bundles_post_ra>
// kernel: tpu_custom_call.1
= control target key start
LH: loop header
LB: loop body
LE: loop exit
PB: predicated region body
PF: predicated region fallthrough
CT: control target
= control target key end

     0   :  { %10 = vsyncpa [#allocation3], 0  ;;  %s535_s0 = inlined_call_operand.hbm [shape: f32[2,8,32], index: 0, kind: input, shape index: {}]   ;;  %s536_s1 = inlined_call_operand.vmem [shape: f32[2,8], index: 1, kind: input, shape index: {}]   ;;  %s537_s2 = inlined_call_operand.hbm [shape: f32[32,32], index: 2, kind: input, shape index: {}]   ;;  %s538_s3 = inlined_call_operand.vmem [shape: f32[1,32], index: 3, kind: input, shape index: {}]   ;;  %s539_s4 = inlined_call_operand.vmem [shape: f32[1,32], index: 4, kind: input, shape index: {}]   ;;  %s540_s5 = inlined_call_operand.hbm [shape: f32[2,32], index: 5, kind: output, shape index: {}]  }
   0x1   :  { %11 = vsyncpa [#allocation6], 0 }
   0x2   :  { %12 = vsyncpa [#allocation4], 0  ;;  %s425_s18 = smov [#allocation2]   ;;  %s353_s22 = scalar_lea.hbm %s535_s0, 256 }
   0x3   :  { %s18_s19 = sshll.u32 %s425_s18, 4  ;;  %p354_p0 = scmp.ne.s32.totalorder %s535_s0, %s353_s22  ;;  %s19_s19 = int_to_ptr.vmem [resolvable:$true] %s18_s19 }
   0x4   :  { %p357_p1 = scmp.lt.u32.totalorder %s353_s22, %s535_s0 }
   0x6   :  { %p359_p2 = pnand %p357_p1, %p354_p0 }
   0x8   :  { %362 = shalt.err (!%p359_p2)
}
   0x9   :  { %s363_s27 = scalar_lea.vmem %s19_s19, 256  ;;  %p368_p4 = scmp.lt.s32.totalorder %s19_s19, %s19_s19 }
   0xa   :  { %p364_p3 = scmp.ne.s32.totalorder %s19_s19, %s363_s27  ;;  %p369_p5 = scmp.lt.s32.totalorder %s363_s27, %s363_s27 }
   0xc   :  { %p370_p6 = por %p369_p5, %p368_p4 }
   0xe   :  { %p371_p7 = pnand %p370_p6, %p364_p3 }
  0x10   :  { %374 = shalt.err (!%p371_p7)
}
  0x11   :  { %s426_s28 = smov 128   ;;  %s427_s29 = smov 8  }
  0x12   :  { %24 = dma.hbm_to_vmem [thread:$0]  %s535_s0, 256, %s19_s19, [#allocation3], %s426_s28, %s426_s28, %s427_s29  }
  0x13   :  { %s428_s7 = smov [#allocation5]   ;;  %s375_s11 = scalar_lea.hbm %s537_s2, 512 }
  0x14   :  { %s32_s8 = sshll.u32 %s428_s7, 4  ;;  %p376_p8 = scmp.ne.s32.totalorder %s537_s2, %s375_s11  ;;  %s33_s8 = int_to_ptr.vmem [resolvable:$true] %s32_s8 }
  0x15   :  { %p379_p9 = scmp.lt.u32.totalorder %s375_s11, %s537_s2 }
  0x17   :  { %p381_p10 = pnand %p379_p9, %p376_p8 }
  0x19   :  { %384 = shalt.err (!%p381_p10)
}
  0x1a   :  { %s385_s16 = scalar_lea.vmem %s33_s8, 512  ;;  %p390_p12 = scmp.lt.s32.totalorder %s33_s8, %s33_s8 }
  0x1b   :  { %p386_p11 = scmp.ne.s32.totalorder %s33_s8, %s385_s16  ;;  %p391_p13 = scmp.lt.s32.totalorder %s385_s16, %s385_s16 }
  0x1d   :  { %p392_p0 = por %p391_p13, %p390_p12 }
  0x1f   :  { %p393_p1 = pnand %p392_p0, %p386_p11 }
  0x21   :  { %396 = shalt.err (!%p393_p1)
}
  0x22   :  { %38 = dma.hbm_to_vmem [thread:$0]  %s537_s2, 512, %s33_s8, [#allocation6], %s426_s28, %s426_s28, %s427_s29  }
  0x23   :  { %419 = dma.done.wait [#allocation3], 256  }
  0x24   :  { %420 = vsyncadd [#allocation3], 4294967040 }
  0x25   :  { %421 = dma.done.wait [#allocation6], 512  }
  0x26   :  { %422 = vsyncadd [#allocation6], 4294966784  ;;  %vm62_vm0 = vcmask 261120   ;;  %v51_v0 = vld [vmem:[#allocation5] sm:$0xff]  ;;  %v52_v1 = vld [vmem:[#allocation5 + $0x8] sm:$0xff]  ;;  %v163_v8 = vlaneseq  ;;  %v429_v27 = vmov 0  }
  0x27   :  { %v53_v2 = vld [vmem:[#allocation5 + $0x10] sm:$0xff]  ;;  %v327_v3 = vpack.c.bf16 %v52_v1, %v51_v0  ;;  %v54_v4 = vld [vmem:[#allocation5 + $0x18] sm:$0xff]  ;;  %341 = vset.pattern.permute.xlu0 %v429_v27  ;;  %342 = vset.pattern.permute.xlu1 %v429_v27  ;;  %vm199_vm1 = vcmask 1041409   ;;  %vm202_vm2 = vcmask 58368   ;;  %vm288_vm3 = vcmask 254976  }
  0x28   :  { %v485_v5 = vld [vmem:[#allocation2] sm:$0xff]  ;;  %v331_v6 = vpack.c.bf16 %v54_v4, %v53_v2  ;;  %v489_v7 = vld [vmem:[#allocation2 + $0x8] sm:$0xff]  ;;  %v164_v9 = vshrl.u32 %v163_v8, 7  ;;  %v190_v34 = vand.u32 127, %v163_v8 }
  0x29   :  { %324 = vmatprep.mubr.msk.f32.mxu0 %vm62_vm0, %v485_v5  ;;  %328 = vmatprep.subr.bf16.mxu0 %v327_v3  ;;  %v161_v10 = vld [vmem:[%s536_s1] sm:$0x3] }
  0x2a   :  { %330 = vmatpush3.bf16.msra.mxu0 %v327_v3  ;;  %v496_v11 = vsub.s32 0, %v164_v9  ;;  %v498_v12 = vsub.s32 1, %v164_v9  ;;  %v306_v15 = vld [vmem:[%s538_s3] ss:$0 sm:$0xff]  ;;  %v193_v35 = vsub.s32 %v190_v34, %v164_v9  ;;  %s430_s3 = smov [#allocation7]  }
  0x2b   :  { %332 = vmatprep.subr.bf16.mxu0 %v331_v6  ;;  %v309_v20 = vld [vmem:[%s539_s4] ss:$0 sm:$0xff]  ;;  %s296_s4 = sshll.u32 %s430_s3, 4  ;;  %s297_s4 = int_to_ptr.vmem [resolvable:$true] %s296_s4 }
  0x2c   :  { %v166_v13 = vrot.slane %v161_v10, %v496_v11  ;;  %v173_v14 = vrot.slane %v161_v10, %v498_v12  ;;  %s397_s22 = scalar_lea.vmem %s297_s4, 32  ;;  %p402_p3 = scmp.lt.s32.totalorder %s297_s4, %s297_s4 }
  0x2d   :  { %p398_p2 = scmp.ne.s32.totalorder %s297_s4, %s397_s22  ;;  %p403_p4 = scmp.lt.s32.totalorder %s397_s22, %s397_s22 }
  0x2e   :  { %334 = vmatpush3.bf16.msra.mxu0 %v331_v6  ;;  %168 = vbcast.lane.b32.xlu1 %v166_v13, 256 }
  0x2f   :  { %p404_p5 = por %p403_p4, %p402_p3 }
  0x31   :  { %325 = vmatmul.mubr.msk.f32.vlgmr.msra.gmra.mrb[0].mxu0 %vm62_vm0, %v489_v7  ;;  %p405_p6 = pnand %p404_p5, %p398_p2 }
  0x32   :  { %175 = vbcast.lane.b32.xlu1 %v173_v14, 256 }
  0xa0   :  { %v169_v28 = vpop.permute.xlu1 %168 }
  0xa4   :  { %v176_v31 = vpop.permute.xlu1 %175 }
 0x104   :  { %v326_v16 = vpop.f32.mrb[0].mxu0 }
 0x105   :  { %v141_v17 = vadd.f32 %v326_v16, %v306_v15  ;;  %v135_v18 = vpop.f32.mrb[1].mxu0 }
 0x106   :  { %v136_v19 = vadd.f32 %v306_v15, %v135_v18 }
 0x107   :  { %343 = vtanh.f32 %v141_v17 }
 0x108   :  { %345 = vtanh.f32 %v136_v19 }
 0x111   :  { %v344_v21 = vpop.eup %343 }
 0x112   :  { %v346_v22 = vpop.eup %345  ;;  %v154_v25 = vmul.f32 %v344_v21, %v309_v20 }
 0x113   :  { %v153_v23 = vmul.f32 %v346_v22, %v309_v20 }
 0x114   :  { %v158_v26 = vsel %vm62_vm0, %v154_v25, 0.0 }
 0x115   :  { %v155_v24 = vsel %vm62_vm0, %v153_v23, 0.0 }
 0x116   :  { %156 = vadd.xlane.f32.xlu0 %v155_v24 }
 0x11a   :  { %159 = vadd.xlane.f32.xlu0 %v158_v26 }
 0x1a3   :  { %v157_v29 = vpop.xlane.xlu0 %156 }
 0x1a4   :  { %v179_v30 = vadd.f32 %v169_v28, %v157_v29 }
 0x1a6   :  { %184 = vperm.xlu0 %341, %v179_v30  }
 0x1a7   :  { %v160_v32 = vpop.xlane.xlu0 %159 }
 0x1a8   :  { %v180_v33 = vadd.f32 %v176_v31, %v160_v32 }
 0x1aa   :  { %187 = vperm.xlu1 %342, %v180_v33  }
 0x225   :  { %v185_v36 = vpop.permute.xlu0 %184 }
 0x226   :  { %v194_v38 = vrot.slane %v185_v36, %v193_v35 }
 0x229   :  { %v188_v37 = vpop.permute.xlu1 %187 }
 0x22a   :  { %v198_v39 = vrot.slane %v188_v37, %v193_v35 }
 0x22c   :  { %v200_v40 = vsel %vm199_vm1, %v198_v39, %v194_v38 }
 0x22d   :  { %v203_v41 = vsel %vm202_vm2, %v200_v40, -inf }
 0x22e   :  { %204 = vmax.xlane.f32.xlu1 %v203_v41 }
 0x2bb   :  { %v205_v42 = vpop.xlane.xlu1 %204 }
 0x2bc   :  { %v210_v43 = vrot.slane %v205_v42, %v496_v11  ;;  %v214_v44 = vrot.slane %v205_v42, %v498_v12 }
 0x2be   :  { %v217_v45 = vsub.f32 %v179_v30, %v210_v43  ;;  %v218_v46 = vsub.f32 %v180_v33, %v214_v44 }
 0x2c0   :  { %v219_v47 = vmul.f32 1.442695, %v217_v45  ;;  %v221_v48 = vmul.f32 1.442695, %v218_v46 }
 0x2c2   :  { %347 = vpow2.f32 %v219_v47 }
 0x2c3   :  { %349 = vpow2.f32 %v221_v48 }
 0x2cc   :  { %v348_v49 = vpop.eup %347 }
 0x2cd   :  { %v350_v50 = vpop.eup %349  ;;  %226 = vperm.xlu1 %342, %v348_v49  }
 0x2ce   :  { %229 = vperm.xlu0 %341, %v350_v50  }
 0x34c   :  { %v227_v51 = vpop.permute.xlu1 %226 }
 0x34d   :  { %v230_v52 = vpop.permute.xlu0 %229  ;;  %v234_v53 = vrot.slane %v227_v51, %v193_v35 }
 0x34e   :  { %v238_v54 = vrot.slane %v230_v52, %v193_v35 }
 0x350   :  { %v239_v55 = vsel %vm199_vm1, %v238_v54, %v234_v53 }
 0x351   :  { %v241_v56 = vsel %vm202_vm2, %v239_v55, 0.0 }
 0x352   :  { %242 = vadd.xlane.f32.xlu0 %v241_v56 }
 0x3df   :  { %v243_v57 = vpop.xlane.xlu0 %242 }
 0x3e0   :  { %351 = vrcp.f32 %v243_v57 }
 0x3ea   :  { %v352_v58 = vpop.eup %351 }
 0x3eb   :  { %v249_v59 = vrot.slane %v352_v58, %v496_v11  ;;  %v253_v61 = vrot.slane %v352_v58, %v498_v12 }
 0x3ed   :  { %v256_v60 = vmul.f32 %v348_v49, %v249_v59  ;;  %v257_v62 = vmul.f32 %v350_v50, %v253_v61 }
 0x3ef   :  { %260 = vperm.xlu1 %342, %v256_v60  }
 0x3f3   :  { %265 = vperm.xlu1 %342, %v257_v62  }
 0x46e   :  { %v261_v63 = vpop.permute.xlu1 %260 }
 0x46f   :  { %v268_v0 = vmul.f32 %v261_v63, %v485_v5 }
 0x471   :  { %v270_v1 = vsel %vm62_vm0, %v268_v0, 0.0 }
 0x472   :  { %v271_v2 = vrot.slane %v270_v1, 4  ;;  %v266_v3 = vpop.permute.xlu1 %265 }
 0x473   :  { %v269_v4 = vmul.f32 %v266_v3, %v489_v7 }
 0x474   :  { %v272_v6 = vadd.f32 %v271_v2, %v270_v1 }
 0x475   :  { %v277_v8 = vsel %vm62_vm0, %v269_v4, 0.0 }
 0x476   :  { %v273_v9 = vrot.slane %v272_v6, 2  ;;  %v278_v10 = vrot.slane %v277_v8, 4 }
 0x478   :  { %v274_v11 = vadd.f32 %v273_v9, %v272_v6  ;;  %v279_v13 = vadd.f32 %v278_v10, %v277_v8 }
 0x47a   :  { %v280_v12 = vrot.slane %v279_v13, 2  ;;  %v275_v14 = vrot.slane %v274_v11, 1 }
 0x47c   :  { %v281_v15 = vadd.f32 %v280_v12, %v279_v13  ;;  %v276_v5 = vadd.f32 %v275_v14, %v274_v11 }
 0x47e   :  { %v282_v16 = vrot.slane %v281_v15, 1 }
 0x480   :  { %v283_v17 = vadd.f32 %v282_v16, %v281_v15 }
 0x482   :  { %v286_v18 = vsel %vm199_vm1, %v283_v17, %v276_v5 }
 0x483   :  { %289 = vst.msk [vmem:[#allocation7] sm:$0x3] %vm288_vm3, %v286_v18 }
 0x484   :  { %408 = shalt.err (!%p405_p6)
}
 0x485   :  { %s409_s25 = scalar_lea.hbm %s540_s5, 32 }
 0x486   :  { %p410_p7 = scmp.ne.s32.totalorder %s540_s5, %s409_s25  ;;  %p413_p8 = scmp.lt.u32.totalorder %s409_s25, %s540_s5 }
 0x488   :  { %p415_p9 = pnand %p413_p8, %p410_p7 }
 0x48a   :  { %418 = shalt.err (!%p415_p9)
}
 0x48b   :  { %299 = dma.vmem_to_hbm [thread:$0]  %s297_s4, 32, %s540_s5, [#allocation4]  }
 0x48c   :  { %423 = dma.done.wait [#allocation4], 32  }
 0x48d   :  { %424 = vsyncadd [#allocation4], 4294967264 }
 0x48e   :  { %303 = vsyncpa [#allocation3], 1 }
 0x48f   :  { %304 = vsyncpa [#allocation6], 1 }
 0x490   :  { %305 = vsyncpa [#allocation4], 1 }

</bundles_post_ra>
